<compile_context>
chip_gen: v7x
topology: tpu7x:2x2x1
jax: 0.10.0
libtpu: 0.0.40
codegen_flags: <defaults>
</compile_context>

<pallas_src>
import jax
import jax.numpy as jnp
from jax.experimental import pallas as pl
from jax.experimental.pallas import tpu as pltpu


def _round_up(x, m):
    return ((x + m - 1) // m) * m


def dqn_kernel(x_ref, w1_ref, b1_ref, w2_ref, b2_ref, w3_ref, b3_ref, o_ref):
    # Pack the streamed f32 tile to bf16 right before the MXU (single-pass
    # bf16 matmul instead of multi-pass f32 matmul); accumulate in f32.
    x = x_ref[...].astype(jnp.bfloat16)

    # fc1: (TB, D) @ (D, 24) + b1 -> relu   (bias/relu in f32)
    h1 = jnp.dot(x, w1_ref[...], preferred_element_type=jnp.float32) + b1_ref[...]
    h1 = jnp.maximum(h1, 0.0)

    # fc2: (TB, 24) @ (24, 32) + b2 -> relu
    h2 = jnp.dot(h1.astype(jnp.bfloat16), w2_ref[...],
                 preferred_element_type=jnp.float32) + b2_ref[...]
    h2 = jnp.maximum(h2, 0.0)

    # out: (TB, 32) @ (32, 2) + b3
    out = jnp.dot(h2.astype(jnp.bfloat16), w3_ref[...],
                  preferred_element_type=jnp.float32) + b3_ref[...]
    o_ref[...] = out.astype(o_ref.dtype)


def dqn_forward(x_nchw, params, *, block_b=4096):
    """x_nchw: (B, 3, H, W) float32.  Returns (B, 2) float32."""
    w1, b1, w2, b2, w3, b3 = params
    B = x_nchw.shape[0]
    D = x_nchw.shape[1] * x_nchw.shape[2] * x_nchw.shape[3]

    # Same flatten semantics as torch .flatten(start_dim=1) on contiguous
    # NCHW; metadata-only reshape, x stays f32 in HBM (no extra HBM pass).
    x = x_nchw.reshape(B, D)

    # Batch tile: multiple of 8 (f32 sublane), capped at block_b.  D is NOT
    # padded in HBM (the K/lane padding happens for free on-chip).
    TB = min(_round_up(block_b, 8), _round_up(max(B, 1), 8))
    num_blocks = pl.cdiv(B, TB)
    B_pad = num_blocks * TB  # only the (tiny) output is padded; x is not.

    # Weights shipped as bf16 (VMEM-resident across the whole grid); biases
    # kept 2D (1, N) f32 so they broadcast along the batch dim in-kernel.
    w1b = w1.astype(jnp.bfloat16)
    w2b = w2.astype(jnp.bfloat16)
    w3b = w3.astype(jnp.bfloat16)
    b1_2d = b1.reshape(1, -1)
    b2_2d = b2.reshape(1, -1)
    b3_2d = b3.reshape(1, -1)

    # Constant index maps -> weights/biases DMA'd once, stay in VMEM.
    const = lambda arr: pl.BlockSpec(arr.shape, lambda i: (0,) * arr.ndim)

    out = pl.pallas_call(
        dqn_kernel,
        out_shape=jax.ShapeDtypeStruct((B_pad, 2), jnp.float32),
        grid=(num_blocks,),
        in_specs=[
            pl.BlockSpec((TB, D), lambda i: (i, 0)),   # streamed batch tiles
            const(w1b), const(b1_2d),
            const(w2b), const(b2_2d),
            const(w3b), const(b3_2d),
        ],
        out_specs=pl.BlockSpec((TB, 2), lambda i: (i, 0)),
        compiler_params=pltpu.CompilerParams(
            dimension_semantics=("parallel",),
            vmem_limit_bytes=32 * 1024 * 1024,
        ),
    )(x, w1b, b1_2d, w2b, b2_2d, w3b, b3_2d)

    return out[:B]


def init_params(key, height, breath):
    """Deterministic init matching nn.Linear shapes (weights stored transposed:
    (in, out) so the kernel does x @ W)."""
    d_in = breath * height * 3
    dims = [(d_in, 24), (24, 32), (32, 2)]
    params = []
    for fi, fo in dims:
        kw, kb, key = jax.random.split(key, 3)
        bound = 1.0 / jnp.sqrt(jnp.float32(fi))
        w = jax.random.uniform(kw, (fi, fo), jnp.float32, -bound, bound)
        b = jax.random.uniform(kb, (fo,), jnp.float32, -bound, bound)
        params.extend([w, b])
    return tuple(params)


def _reference(x_nchw, params):
    """Pure-JAX reference mirroring the kernel's bf16-operand / f32-accumulate
    matmul path (same cast points as the kernel)."""
    w1, b1, w2, b2, w3, b3 = params
    B = x_nchw.shape[0]
    x = x_nchw.reshape(B, -1).astype(jnp.bfloat16)
    h = jnp.dot(x, w1.astype(jnp.bfloat16),
                preferred_element_type=jnp.float32) + b1
    h = jnp.maximum(h, 0.0)
    h = jnp.dot(h.astype(jnp.bfloat16), w2.astype(jnp.bfloat16),
                preferred_element_type=jnp.float32) + b2
    h = jnp.maximum(h, 0.0)
    return jnp.dot(h.astype(jnp.bfloat16), w3.astype(jnp.bfloat16),
                   preferred_element_type=jnp.float32) + b3


if __name__ == "__main__":
    key = jax.random.PRNGKey(0)
    height, breath = 8, 8          # D = 3*8*8 = 192

    kx, kp, kx2 = jax.random.split(key, 3)
    params = init_params(kp, height, breath)

    # Small batch: single (edge) tile, B=2 handled via masked edge block.
    batch = 2
    x = jax.random.normal(kx, (batch, 3, height, breath), jnp.float32)
    out = jax.block_until_ready(dqn_forward(x, params))
    ref = _reference(x, params)
    assert out.shape == (batch, 2)
    assert jnp.allclose(out, ref, atol=2e-2, rtol=2e-2)

    # Multi-tile grid + ragged last tile (B=40, TB forced to 16 -> grid=(3,)).
    batch2 = 40
    x2 = jax.random.normal(kx2, (batch2, 3, height, breath), jnp.float32)
    out2 = jax.block_until_ready(dqn_forward(x2, params, block_b=16))
    ref2 = _reference(x2, params)
    assert out2.shape == (batch2, 2)
    assert jnp.allclose(out2, ref2, atol=2e-2, rtol=2e-2)

    print("KERNEL_OK")
</pallas_src>

<mosaic_0001>
module attributes {stable_mosaic.version = 11 : i64} {
  func.func @dqn_kernel(%arg0: i32, %arg1: memref<8x192xf32, #tpu.memory_space<vmem>>, %arg2: memref<192x24xbf16, #tpu.memory_space<vmem>>, %arg3: memref<1x24xf32, #tpu.memory_space<vmem>>, %arg4: memref<24x32xbf16, #tpu.memory_space<vmem>>, %arg5: memref<1x32xf32, #tpu.memory_space<vmem>>, %arg6: memref<32x2xbf16, #tpu.memory_space<vmem>>, %arg7: memref<1x2xf32, #tpu.memory_space<vmem>>, %arg8: memref<8x2xf32, #tpu.memory_space<vmem>>) attributes {dimension_semantics = [#tpu.dimension_semantics<parallel>], iteration_bounds = array<i64: 1>, scalar_prefetch = 0 : i64, scratch_operands = 0 : i64, tpu.core_type = #tpu.core_type<tc>, window_params = [{transform_indices = @transform_0, window_bounds = array<i64: 8, 192>}, {pipeline_mode = #tpu.pipeline_mode<synchronous>, transform_indices = @transform_1, window_bounds = array<i64: 192, 24>}, {pipeline_mode = #tpu.pipeline_mode<synchronous>, transform_indices = @transform_2, window_bounds = array<i64: 1, 24>}, {pipeline_mode = #tpu.pipeline_mode<synchronous>, transform_indices = @transform_3, window_bounds = array<i64: 24, 32>}, {pipeline_mode = #tpu.pipeline_mode<synchronous>, transform_indices = @transform_4, window_bounds = array<i64: 1, 32>}, {pipeline_mode = #tpu.pipeline_mode<synchronous>, transform_indices = @transform_5, window_bounds = array<i64: 32, 2>}, {pipeline_mode = #tpu.pipeline_mode<synchronous>, transform_indices = @transform_6, window_bounds = array<i64: 1, 2>}, {transform_indices = @transform_7, window_bounds = array<i64: 8, 2>}]} {
    %c0 = arith.constant 0 : index
    %c0_0 = arith.constant 0 : index
    %0 = vector.load %arg1[%c0, %c0_0] : memref<8x192xf32, #tpu.memory_space<vmem>>, vector<8x192xf32>
    %1 = arith.truncf %0 : vector<8x192xf32> to vector<8x192xbf16>
    %c0_1 = arith.constant 0 : index
    %c0_2 = arith.constant 0 : index
    %2 = vector.load %arg2[%c0_1, %c0_2] : memref<192x24xbf16, #tpu.memory_space<vmem>>, vector<192x24xbf16>
    %cst = arith.constant dense<0.000000e+00> : vector<8x24xf32>
    %3 = tpu.matmul %1, %2, %cst {dimension_numbers = #tpu.dot_dimension_numbers<[1], [0], [0], [1], [0, 0, 1, 1], [], []>} : vector<8x192xbf16>, vector<192x24xbf16>, vector<8x24xf32> -> vector<8x24xf32>
    %c0_3 = arith.constant 0 : index
    %c0_4 = arith.constant 0 : index
    %4 = vector.load %arg3[%c0_3, %c0_4] : memref<1x24xf32, #tpu.memory_space<vmem>>, vector<1x24xf32>
    %5 = vector.broadcast %4 : vector<1x24xf32> to vector<8x24xf32>
    %6 = arith.addf %3, %5 : vector<8x24xf32>
    %cst_5 = arith.constant 0.000000e+00 : f32
    %7 = vector.broadcast %cst_5 : f32 to vector<8x24xf32>
    %8 = arith.maximumf %6, %7 : vector<8x24xf32>
    %9 = arith.truncf %8 : vector<8x24xf32> to vector<8x24xbf16>
    %c0_6 = arith.constant 0 : index
    %c0_7 = arith.constant 0 : index
    %10 = vector.load %arg4[%c0_6, %c0_7] : memref<24x32xbf16, #tpu.memory_space<vmem>>, vector<24x32xbf16>
    %cst_8 = arith.constant dense<0.000000e+00> : vector<8x32xf32>
    %11 = tpu.matmul %9, %10, %cst_8 {dimension_numbers = #tpu.dot_dimension_numbers<[1], [0], [0], [1], [0, 0, 1, 1], [], []>} : vector<8x24xbf16>, vector<24x32xbf16>, vector<8x32xf32> -> vector<8x32xf32>
    %c0_9 = arith.constant 0 : index
    %c0_10 = arith.constant 0 : index
    %12 = vector.load %arg5[%c0_9, %c0_10] : memref<1x32xf32, #tpu.memory_space<vmem>>, vector<1x32xf32>
    %13 = vector.broadcast %12 : vector<1x32xf32> to vector<8x32xf32>
    %14 = arith.addf %11, %13 : vector<8x32xf32>
    %cst_11 = arith.constant 0.000000e+00 : f32
    %15 = vector.broadcast %cst_11 : f32 to vector<8x32xf32>
    %16 = arith.maximumf %14, %15 : vector<8x32xf32>
    %17 = arith.truncf %16 : vector<8x32xf32> to vector<8x32xbf16>
    %c0_12 = arith.constant 0 : index
    %c0_13 = arith.constant 0 : index
    %18 = vector.load %arg6[%c0_12, %c0_13] : memref<32x2xbf16, #tpu.memory_space<vmem>>, vector<32x2xbf16>
    %cst_14 = arith.constant dense<0.000000e+00> : vector<8x2xf32>
    %19 = tpu.matmul %17, %18, %cst_14 {dimension_numbers = #tpu.dot_dimension_numbers<[1], [0], [0], [1], [0, 0, 1, 1], [], []>} : vector<8x32xbf16>, vector<32x2xbf16>, vector<8x2xf32> -> vector<8x2xf32>
    %c0_15 = arith.constant 0 : index
    %c0_16 = arith.constant 0 : index
    %20 = vector.load %arg7[%c0_15, %c0_16] : memref<1x2xf32, #tpu.memory_space<vmem>>, vector<1x2xf32>
    %21 = vector.broadcast %20 : vector<1x2xf32> to vector<8x2xf32>
    %22 = arith.addf %19, %21 : vector<8x2xf32>
    %c0_17 = arith.constant 0 : index
    %c0_18 = arith.constant 0 : index
    %23 = vector.load %arg8[%c0_17, %c0_18] : memref<8x2xf32, #tpu.memory_space<vmem>>, vector<8x2xf32>
    tpu.vector_store %arg8[%c0_17, %c0_18], %22 {strides = array<i32>} : memref<8x2xf32, #tpu.memory_space<vmem>>, vector<8x2xf32>,
    return
  }
  func.func @transform_0(%arg0: i32) -> (i32, i32) {
    %c0_i32 = arith.constant 0 : i32
    %c0_i32_0 = arith.constant 0 : i32
    return %arg0, %c0_i32 : i32, i32
  }
  func.func @transform_1(%arg0: i32) -> (i32, i32) {
    %c0_i32 = arith.constant 0 : i32
    %c0_i32_0 = arith.constant 0 : i32
    %c0_i32_1 = arith.constant 0 : i32
    return %c0_i32, %c0_i32_0 : i32, i32
  }
  func.func @transform_2(%arg0: i32) -> (i32, i32) {
    %c0_i32 = arith.constant 0 : i32
    %c0_i32_0 = arith.constant 0 : i32
    %c0_i32_1 = arith.constant 0 : i32
    return %c0_i32, %c0_i32_0 : i32, i32
  }
  func.func @transform_3(%arg0: i32) -> (i32, i32) {
    %c0_i32 = arith.constant 0 : i32
    %c0_i32_0 = arith.constant 0 : i32
    %c0_i32_1 = arith.constant 0 : i32
    return %c0_i32, %c0_i32_0 : i32, i32
  }
  func.func @transform_4(%arg0: i32) -> (i32, i32) {
    %c0_i32 = arith.constant 0 : i32
    %c0_i32_0 = arith.constant 0 : i32
    %c0_i32_1 = arith.constant 0 : i32
    return %c0_i32, %c0_i32_0 : i32, i32
  }
  func.func @transform_5(%arg0: i32) -> (i32, i32) {
    %c0_i32 = arith.constant 0 : i32
    %c0_i32_0 = arith.constant 0 : i32
    %c0_i32_1 = arith.constant 0 : i32
    return %c0_i32, %c0_i32_0 : i32, i32
  }
  func.func @transform_6(%arg0: i32) -> (i32, i32) {
    %c0_i32 = arith.constant 0 : i32
    %c0_i32_0 = arith.constant 0 : i32
    %c0_i32_1 = arith.constant 0 : i32
    return %c0_i32, %c0_i32_0 : i32, i32
  }
  func.func @transform_7(%arg0: i32) -> (i32, i32) {
    %c0_i32 = arith.constant 0 : i32
    %c0_i32_0 = arith.constant 0 : i32
    return %arg0, %c0_i32 : i32, i32
  }
}

</mosaic_0001>

<bundles_post_ra>
// kernel: tpu_custom_call.1
= control target key start
LH: loop header
LB: loop body
LE: loop exit
PB: predicated region body
PF: predicated region fallthrough
CT: control target
= control target key end

     0   :  { %v416_v0 = vmov 0   ;;  %v417_v2 = vmov 0.0   ;;  %vm160_vm0 = vcmask 523264   ;;  %vm229_vm1 = vcmask 1043456   ;;  %s533_s1 = inlined_call_operand.vmem [shape: bf16[192,24], index: 1, kind: input, shape index: {}]   ;;  %s534_s0 = inlined_call_operand.vmem [shape: f32[2,192], index: 0, kind: input, shape index: {}]   ;;  %s535_s3 = inlined_call_operand.vmem [shape: bf16[24,32], index: 3, kind: input, shape index: {}]   ;;  %s536_s5 = inlined_call_operand.vmem [shape: bf16[32,2], index: 5, kind: input, shape index: {}]   ;;  %s537_s2 = inlined_call_operand.vmem [shape: f32[1,24], index: 2, kind: input, shape index: {}]   ;;  %s538_s4 = inlined_call_operand.vmem [shape: f32[1,32], index: 4, kind: input, shape index: {}]   ;;  %s539_s6 = inlined_call_operand.vmem [shape: f32[1,2], index: 6, kind: input, shape index: {}]   ;;  %s540_s7 = inlined_call_operand.vmem [shape: f32[8,2], index: 7, kind: output, shape index: {}]  }
   0x1   :  { %164 = vmatprep.subr.bf16.mxu0 %v416_v0  ;;  %v396_v1 = vld [vmem:[%s533_s1] sm:$0xff]   ;;  %376 = vmatprep.subr.bf16.mxu1 %v417_v2  ;;  %v397_v3 = vld [vmem:[%s533_s1 + $0x8] sm:$0xff]   ;;  %v398_v4 = vld [vmem:[%s533_s1 + $0x10] sm:$0xff]   ;;  %vm418_vm2 = vmmov 0   ;;  %vm225_vm3 = vcmask 195584   ;;  %vm298_vm4 = vcmask 261120  }
   0x2   :  { %165 = vmatpush1.bf16.msra.mxu0 %v396_v1  ;;  %v399_v5 = vld [vmem:[%s533_s1 + $0x18] sm:$0xff]   ;;  %v414_v6 = vld.sshfl [vmem:[%s534_s0] sm:$0xff pattern:$0x76325410]  ;;  %v401_v10 = vld [vmem:[%s533_s1 + $0x28] sm:$0xff]   ;;  %380 = vmatprep.mubr.msk.bf16.mxu1 %vm418_vm2, %v417_v2  ;;  %vm342_vm5 = vcmask 15360  }
   0x3   :  { %166 = vmatprep.subr.bf16.mxu0 %v416_v0  ;;  %v415_v7 = vld.sshfl [vmem:[%s534_s0 + $0x8] sm:$0xff pattern:$0x76325410]  ;;  %v400_v8 = vld [vmem:[%s533_s1 + $0x20] sm:$0xff]   ;;  %v402_v12 = vld [vmem:[%s533_s1 + $0x30] sm:$0xff]  }
   0x4   :  { %v52_v9 = vcombine.high %v414_v6, %v415_v7  ;;  %v403_v13 = vld [vmem:[%s533_s1 + $0x38] sm:$0xff]   ;;  %v404_v14 = vld [vmem:[%s533_s1 + $0x40] sm:$0xff]   ;;  %v405_v15 = vld [vmem:[%s533_s1 + $0x48] sm:$0xff]   ;;  %v51_v17 = vcombine.low %v414_v6, %v415_v7 }
   0x5   :  { %v406_v16 = vld [vmem:[%s533_s1 + $0x50] sm:$0xff]   ;;  %v407_v18 = vld [vmem:[%s533_s1 + $0x58] sm:$0xff]   ;;  %v410_v20 = vld [vmem:[%s535_s3] sm:$0xff]  }
   0x6   :  { %167 = vmatpush1.bf16.msra.mxu0 %v397_v3  ;;  %v56_v11 = vpack.c.bf16 %v52_v9, %v52_v9  ;;  %v55_v19 = vpack.c.bf16 %v51_v17, %v51_v17  ;;  %377 = vmatpush3.bf16.msra.mxu1 %v410_v20  ;;  %v411_v21 = vld [vmem:[%s535_s3 + $0x8] ss:$0 sps:$4 sm:$0xff]   ;;  %v348_v23 = vld [vmem:[%s537_s2] ss:$0 sm:$0xff] }
   0x7   :  { %168 = vmatprep.subr.bf16.mxu0 %v416_v0  ;;  %378 = vmatprep.subr.bf16.mxu1 %v417_v2  ;;  %v231_v22 = vsel %vm229_vm1, %v411_v21, 0  ;;  %v412_v30 = vld [vmem:[%s536_s5] sm:$0xff]   ;;  %v413_v32 = vld [vmem:[%s536_s5 + $0x8] sm:$0xff]  }
   0x8   :  { %361 = vmatprep.mubr.msk.bf16.mxu0 %vm160_vm0, %v56_v11  ;;  %v362_v33 = vld [vmem:[%s538_s4] ss:$0 sm:$0xff] }
   0x9   :  { %v366_v41 = vld [vmem:[%s539_s6] ss:$0 sm:$0xff] }
   0xa   :  { %169 = vmatpush1.bf16.msra.mxu0 %v398_v4  ;;  %379 = vmatpush3.bf16.msra.mxu1 %v231_v22 }
   0xb   :  { %170 = vmatprep.subr.bf16.mxu0 %v416_v0  ;;  %384 = vmatprep.subr.bf16.mxu1 %v417_v2 }
   0xe   :  { %171 = vmatpush1.bf16.msra.mxu0 %v399_v5 }
   0xf   :  { %172 = vmatprep.subr.bf16.mxu0 %v416_v0 }
  0x12   :  { %173 = vmatpush1.bf16.msra.mxu0 %v400_v8 }
  0x13   :  { %174 = vmatprep.subr.bf16.mxu0 %v416_v0 }
  0x16   :  { %175 = vmatpush1.bf16.msra.mxu0 %v401_v10 }
  0x17   :  { %176 = vmatprep.subr.bf16.mxu0 %v416_v0 }
  0x1a   :  { %177 = vmatpush1.bf16.msra.mxu0 %v402_v12 }
  0x1b   :  { %178 = vmatprep.subr.bf16.mxu0 %v416_v0 }
  0x1e   :  { %179 = vmatpush1.bf16.msra.mxu0 %v403_v13 }
  0x1f   :  { %180 = vmatprep.subr.bf16.mxu0 %v416_v0 }
  0x22   :  { %181 = vmatpush1.bf16.msra.mxu0 %v404_v14 }
  0x23   :  { %182 = vmatprep.subr.bf16.mxu0 %v416_v0 }
  0x26   :  { %183 = vmatpush1.bf16.msra.mxu0 %v405_v15 }
  0x27   :  { %184 = vmatprep.subr.bf16.mxu0 %v416_v0 }
  0x2a   :  { %185 = vmatpush1.bf16.msra.mxu0 %v406_v16 }
  0x2b   :  { %186 = vmatprep.subr.bf16.mxu0 %v416_v0 }
  0x2e   :  { %187 = vmatpush1.bf16.msra.mxu0 %v407_v18 }
  0x31   :  { %197 = vmatmul.mubr.bf16.vlgmr.msra.gmra.mrb[0].mxu0 %v55_v19 }
 0x104   :  { %v198_v24 = vpop.f32.mrb[0].mxu0 }
 0x105   :  { %v199_v25 = vadd.f32 %v348_v23, %v198_v24  ;;  %v200_v26 = vpop.f32.mrb[1].mxu0 }
 0x106   :  { %v201_v27 = vpop.f32.mrb[2].mxu0 }
 0x107   :  { %v204_v28 = vmax.f32 %v199_v25, 0.0  ;;  %v202_v29 = vpop.f32.mrb[3].mxu0 }
 0x109   :  { %v205_v31 = vpack.c.bf16 %v204_v28, %v204_v28 }
 0x10b   :  { %381 = vmatmul.mubr.msk.bf16.vlgmr.msra.gmra.mrb[0].mxu1 %vm225_vm3, %v205_v31 }
 0x10c   :  { %385 = vmatpush3.bf16.msra.mxu1 %v412_v30  ;;  %388 = vmatprep.mubr.msk.bf16.mxu1 %vm418_vm2, %v417_v2 }
 0x10d   :  { %386 = vmatprep.subr.bf16.mxu1 %v417_v2 }
 0x110   :  { %387 = vmatpush3.bf16.msra.mxu1 %v413_v32 }
 0x1de   :  { %v267_v34 = vpop.f32.mrb[0].mxu1 }
 0x1df   :  { %v268_v35 = vadd.f32 %v362_v33, %v267_v34  ;;  %v382_v36 = vpop.f32.mrb[1].mxu1 }
 0x1e0   :  { %v270_v37 = vpop.f32.mrb[2].mxu1 }
 0x1e1   :  { %v273_v38 = vmax.f32 %v268_v35, 0.0  ;;  %v383_v39 = vpop.f32.mrb[3].mxu1 }
 0x1e3   :  { %v274_v40 = vpack.c.bf16 %v273_v38, %v273_v38 }
 0x1e5   :  { %389 = vmatmul.mubr.msk.bf16.vlgmr.msra.gmra.mrb[4].mxu1 %vm298_vm4, %v274_v40 }
 0x2b8   :  { %v336_v42 = vpop.f32.mrb[4].mxu1 }
 0x2b9   :  { %v337_v43 = vadd.f32 %v366_v41, %v336_v42  ;;  %v390_v44 = vpop.f32.mrb[5].mxu1 }
 0x2ba   :  { %v339_v45 = vpop.f32.mrb[6].mxu1 }
 0x2bb   :  { %343 = vst.msk [vmem:[%s540_s7] sm:$0xff] %vm342_vm5, %v337_v43  ;;  %v391_v46 = vpop.f32.mrb[7].mxu1 }

</bundles_post_ra>
